<compile_context>
chip_gen: v7x
topology: tpu7x:2x2x1
jax: 0.10.0
libtpu: 0.0.40
codegen_flags: <defaults>
</compile_context>

<pallas_src>
import jax
import jax.numpy as jnp
from jax.experimental import pallas as pl
from jax.experimental.pallas import tpu as pltpu

INPUT_DIM = 784
HIDDEN = 100
NUM_CLASSES = 10

# Lane-aligned padded feature dims (multiples of 128).
HIDDEN_PAD = 128
CLASS_PAD = 128


def mlp_kernel(x_ref, w1_ref, b1_ref, w2_ref, b2_ref, o_ref):
    # Whole hot path (two matmuls, ReLUs, masked softmax) runs inside the kernel.
    x = x_ref[...]                                                      # (TB, 784) f32
    h = jnp.dot(x, w1_ref[...], preferred_element_type=jnp.float32) + b1_ref[...]
    h = jnp.maximum(h, 0.0)                                             # ReLU (padded hidden lanes stay 0)
    z = jnp.dot(h, w2_ref[...], preferred_element_type=jnp.float32) + b2_ref[...]
    z = jnp.maximum(z, 0.0)                                             # ReLU

    # Mask the padded class lanes to -inf so they contribute exp(.) == 0 to the softmax.
    lane = jax.lax.broadcasted_iota(jnp.int32, z.shape, 1)
    z = jnp.where(lane < NUM_CLASSES, z, -jnp.inf)

    # Numerically-stable softmax over the (padded) class axis. Exact divide so each
    # row sums to 1 (approx reciprocal perturbed the row sums).
    z = z - jnp.max(z, axis=-1, keepdims=True)
    e = jnp.exp(z)
    denom = jnp.sum(e, axis=-1, keepdims=True)
    o_ref[...] = e / denom                                              # lane-dense (TB, 128) store


def simple_mlp_forward(x, w1, b1, w2, b2, *, batch_tile=512):
    """x: (B, 784); w1: (784, 100); b1: (100,)|(1,100); w2: (100, 10); b2: (10,)|(1,10)."""
    B, D = x.shape
    assert D == INPUT_DIM

    # --- choose an effective batch tile (multiple of 8, no larger than the padded batch) ---
    b_pad8 = max(8, ((B + 7) // 8) * 8)
    tile = max(8, (min(batch_tile, b_pad8) // 8) * 8)
    Bp = ((B + tile - 1) // tile) * tile
    grid = (Bp // tile,)

    # --- pad inputs/params to lane-friendly shapes (wrapper-side, not in the kernel) ---
    xf = x.astype(jnp.float32)
    if Bp != B:
        xf = jnp.pad(xf, ((0, Bp - B), (0, 0)))

    w1p = jnp.zeros((INPUT_DIM, HIDDEN_PAD), jnp.float32).at[:, :HIDDEN].set(
        w1.astype(jnp.float32))
    b1p = jnp.zeros((1, HIDDEN_PAD), jnp.float32).at[:, :HIDDEN].set(
        b1.reshape(1, HIDDEN).astype(jnp.float32))
    w2p = jnp.zeros((HIDDEN_PAD, CLASS_PAD), jnp.float32).at[:HIDDEN, :NUM_CLASSES].set(
        w2.astype(jnp.float32))
    b2p = jnp.zeros((1, CLASS_PAD), jnp.float32).at[:, :NUM_CLASSES].set(
        b2.reshape(1, NUM_CLASSES).astype(jnp.float32))

    out_padded = pl.pallas_call(
        mlp_kernel,
        out_shape=jax.ShapeDtypeStruct((Bp, CLASS_PAD), jnp.float32),
        grid_spec=pltpu.PrefetchScalarGridSpec(
            num_scalar_prefetch=0,
            grid=grid,
            in_specs=[
                pl.BlockSpec((tile, INPUT_DIM), lambda i: (i, 0)),        # x tile (streams)
                pl.BlockSpec((INPUT_DIM, HIDDEN_PAD), lambda i: (0, 0)),  # w1 (resident)
                pl.BlockSpec((1, HIDDEN_PAD), lambda i: (0, 0)),          # b1
                pl.BlockSpec((HIDDEN_PAD, CLASS_PAD), lambda i: (0, 0)),  # w2 (resident)
                pl.BlockSpec((1, CLASS_PAD), lambda i: (0, 0)),           # b2
            ],
            out_specs=pl.BlockSpec((tile, CLASS_PAD), lambda i: (i, 0)),  # lane-dense output
        ),
        compiler_params=pltpu.CompilerParams(
            dimension_semantics=("parallel",),  # shards batch across TCs on v7x
        ),
    )(xf, w1p, b1p, w2p, b2p)

    # Strip batch padding and the padded class lanes.
    return out_padded[:B, :NUM_CLASSES]


def init_params(key):
    # Deterministic init mimicking nn.Linear's U(-1/sqrt(fan_in), 1/sqrt(fan_in)).
    k1, k2, k3, k4 = jax.random.split(key, 4)
    bound1 = 1.0 / (INPUT_DIM ** 0.5)
    bound2 = 1.0 / (HIDDEN ** 0.5)
    w1 = jax.random.uniform(k1, (INPUT_DIM, HIDDEN), jnp.float32, -bound1, bound1)
    b1 = jax.random.uniform(k2, (1, HIDDEN), jnp.float32, -bound1, bound1)
    w2 = jax.random.uniform(k3, (HIDDEN, NUM_CLASSES), jnp.float32, -bound2, bound2)
    b2 = jax.random.uniform(k4, (1, NUM_CLASSES), jnp.float32, -bound2, bound2)
    return w1, b1, w2, b2


if __name__ == "__main__":
    key = jax.random.PRNGKey(0)
    kx, kp = jax.random.split(key)

    # Small deterministic test. B=12 is not a tile multiple (exercises batch padding);
    # batch_tile=8 gives a grid of length 2 (exercises multi-step pipeline / 2-TC path).
    B = 12
    x = jax.random.normal(kx, (B, INPUT_DIM), jnp.float32)
    w1, b1, w2, b2 = init_params(kp)

    out = simple_mlp_forward(x, w1, b1, w2, b2, batch_tile=8)
    out = jax.block_until_ready(out)

    # Reference check in plain JAX (same math as the PyTorch forward).
    h_ref = jnp.maximum(x @ w1 + b1, 0.0)
    z_ref = jnp.maximum(h_ref @ w2 + b2, 0.0)
    ref = jax.nn.softmax(z_ref, axis=-1)

    assert out.shape == (B, NUM_CLASSES)
    assert jnp.allclose(out, ref, atol=1e-4, rtol=1e-4)
    assert jnp.allclose(jnp.sum(out, axis=-1), 1.0, atol=1e-4)

    print("KERNEL_OK")
</pallas_src>

<mosaic_0001>
module attributes {stable_mosaic.version = 11 : i64} {
  func.func @mlp_kernel(%arg0: i32, %arg1: memref<8x784xf32, #tpu.memory_space<vmem>>, %arg2: memref<784x128xf32, #tpu.memory_space<vmem>>, %arg3: memref<1x128xf32, #tpu.memory_space<vmem>>, %arg4: memref<128x128xf32, #tpu.memory_space<vmem>>, %arg5: memref<1x128xf32, #tpu.memory_space<vmem>>, %arg6: memref<8x128xf32, #tpu.memory_space<vmem>>) attributes {dimension_semantics = [#tpu.dimension_semantics<parallel>], iteration_bounds = array<i64: 2>, scalar_prefetch = 0 : i64, scratch_operands = 0 : i64, tpu.core_type = #tpu.core_type<tc>, window_params = [{transform_indices = @transform_0, window_bounds = array<i64: 8, 784>}, {pipeline_mode = #tpu.pipeline_mode<synchronous>, transform_indices = @transform_1, window_bounds = array<i64: 784, 128>}, {pipeline_mode = #tpu.pipeline_mode<synchronous>, transform_indices = @transform_2, window_bounds = array<i64: 1, 128>}, {pipeline_mode = #tpu.pipeline_mode<synchronous>, transform_indices = @transform_3, window_bounds = array<i64: 128, 128>}, {pipeline_mode = #tpu.pipeline_mode<synchronous>, transform_indices = @transform_4, window_bounds = array<i64: 1, 128>}, {transform_indices = @transform_5, window_bounds = array<i64: 8, 128>}]} {
    %c0 = arith.constant 0 : index
    %c0_0 = arith.constant 0 : index
    %0 = vector.load %arg1[%c0, %c0_0] : memref<8x784xf32, #tpu.memory_space<vmem>>, vector<8x784xf32>
    %c0_1 = arith.constant 0 : index
    %c0_2 = arith.constant 0 : index
    %1 = vector.load %arg2[%c0_1, %c0_2] : memref<784x128xf32, #tpu.memory_space<vmem>>, vector<784x128xf32>
    %cst = arith.constant dense<0.000000e+00> : vector<8x128xf32>
    %2 = tpu.matmul %0, %1, %cst {dimension_numbers = #tpu.dot_dimension_numbers<[1], [0], [0], [1], [0, 0, 1, 1], [], []>} : vector<8x784xf32>, vector<784x128xf32>, vector<8x128xf32> -> vector<8x128xf32>
    %c0_3 = arith.constant 0 : index
    %c0_4 = arith.constant 0 : index
    %3 = vector.load %arg3[%c0_3, %c0_4] : memref<1x128xf32, #tpu.memory_space<vmem>>, vector<1x128xf32>
    %4 = vector.broadcast %3 : vector<1x128xf32> to vector<8x128xf32>
    %5 = arith.addf %2, %4 : vector<8x128xf32>
    %cst_5 = arith.constant 0.000000e+00 : f32
    %6 = vector.broadcast %cst_5 : f32 to vector<8x128xf32>
    %7 = arith.maximumf %5, %6 : vector<8x128xf32>
    %c0_6 = arith.constant 0 : index
    %c0_7 = arith.constant 0 : index
    %8 = vector.load %arg4[%c0_6, %c0_7] : memref<128x128xf32, #tpu.memory_space<vmem>>, vector<128x128xf32>
    %cst_8 = arith.constant dense<0.000000e+00> : vector<8x128xf32>
    %9 = tpu.matmul %7, %8, %cst_8 {dimension_numbers = #tpu.dot_dimension_numbers<[1], [0], [0], [1], [0, 0, 1, 1], [], []>} : vector<8x128xf32>, vector<128x128xf32>, vector<8x128xf32> -> vector<8x128xf32>
    %c0_9 = arith.constant 0 : index
    %c0_10 = arith.constant 0 : index
    %10 = vector.load %arg5[%c0_9, %c0_10] : memref<1x128xf32, #tpu.memory_space<vmem>>, vector<1x128xf32>
    %11 = vector.broadcast %10 : vector<1x128xf32> to vector<8x128xf32>
    %12 = arith.addf %9, %11 : vector<8x128xf32>
    %cst_11 = arith.constant 0.000000e+00 : f32
    %13 = vector.broadcast %cst_11 : f32 to vector<8x128xf32>
    %14 = arith.maximumf %12, %13 : vector<8x128xf32>
    %15 = tpu.iota {dimensions = array<i32: 1>} : vector<8x128xi32>
    %c10_i32 = arith.constant 10 : i32
    %16 = vector.broadcast %c10_i32 : i32 to vector<8x128xi32>
    %17 = arith.cmpi slt, %15, %16 : vector<8x128xi32>
    %cst_12 = arith.constant 0xFF800000 : f32
    %18 = vector.broadcast %cst_12 : f32 to vector<8x128xf32>
    %19 = arith.select %17, %14, %18 : vector<8x128xi1>, vector<8x128xf32>
    %cst_13 = arith.constant dense<0xFF800000> : vector<8xf32>
    %20 = vector.multi_reduction <maximumf>, %19, %cst_13 [1] : vector<8x128xf32> to vector<8xf32>
    %21 = vector.shape_cast %20 : vector<8xf32> to vector<8x1xf32>
    %22 = vector.broadcast %21 : vector<8x1xf32> to vector<8x128xf32>
    %23 = arith.subf %19, %22 : vector<8x128xf32>
    %24 = math.exp %23 : vector<8x128xf32>
    %cst_14 = arith.constant dense<0.000000e+00> : vector<8xf32>
    %25 = vector.multi_reduction <add>, %24, %cst_14 [1] : vector<8x128xf32> to vector<8xf32>
    %26 = vector.shape_cast %25 : vector<8xf32> to vector<8x1xf32>
    %27 = vector.broadcast %26 : vector<8x1xf32> to vector<8x128xf32>
    %28 = arith.divf %24, %27 : vector<8x128xf32>
    %c0_15 = arith.constant 0 : index
    %c0_16 = arith.constant 0 : index
    %29 = vector.load %arg6[%c0_15, %c0_16] : memref<8x128xf32, #tpu.memory_space<vmem>>, vector<8x128xf32>
    tpu.vector_store %arg6[%c0_15, %c0_16], %28 {strides = array<i32>} : memref<8x128xf32, #tpu.memory_space<vmem>>, vector<8x128xf32>,
    return
  }
  func.func @transform_0(%arg0: i32) -> (i32, i32) {
    %c0_i32 = arith.constant 0 : i32
    %c0_i32_0 = arith.constant 0 : i32
    return %arg0, %c0_i32 : i32, i32
  }
  func.func @transform_1(%arg0: i32) -> (i32, i32) {
    %c0_i32 = arith.constant 0 : i32
    %c0_i32_0 = arith.constant 0 : i32
    %c0_i32_1 = arith.constant 0 : i32
    return %c0_i32, %c0_i32_0 : i32, i32
  }
  func.func @transform_2(%arg0: i32) -> (i32, i32) {
    %c0_i32 = arith.constant 0 : i32
    %c0_i32_0 = arith.constant 0 : i32
    %c0_i32_1 = arith.constant 0 : i32
    return %c0_i32, %c0_i32_0 : i32, i32
  }
  func.func @transform_3(%arg0: i32) -> (i32, i32) {
    %c0_i32 = arith.constant 0 : i32
    %c0_i32_0 = arith.constant 0 : i32
    %c0_i32_1 = arith.constant 0 : i32
    return %c0_i32, %c0_i32_0 : i32, i32
  }
  func.func @transform_4(%arg0: i32) -> (i32, i32) {
    %c0_i32 = arith.constant 0 : i32
    %c0_i32_0 = arith.constant 0 : i32
    %c0_i32_1 = arith.constant 0 : i32
    return %c0_i32, %c0_i32_0 : i32, i32
  }
  func.func @transform_5(%arg0: i32) -> (i32, i32) {
    %c0_i32 = arith.constant 0 : i32
    %c0_i32_0 = arith.constant 0 : i32
    return %arg0, %c0_i32 : i32, i32
  }
}

</mosaic_0001>

<bundles_post_ra>
// kernel: tpu_custom_call.1
= control target key start
LH: loop header
LB: loop body
LE: loop exit
PB: predicated region body
PF: predicated region fallthrough
CT: control target
= control target key end

     0   :  { %10 = vsyncpa [#allocation3], 0  ;;  %s1715_s0 = inlined_call_operand.hbm [shape: f32[16,784], index: 0, kind: input, shape index: {}]   ;;  %s1716_s1 = inlined_call_operand.hbm [shape: f32[784,128], index: 1, kind: input, shape index: {}]   ;;  %s1717_s2 = inlined_call_operand.vmem [shape: f32[1,128], index: 2, kind: input, shape index: {}]   ;;  %s1718_s3 = inlined_call_operand.hbm [shape: f32[128,128], index: 3, kind: input, shape index: {}]   ;;  %s1719_s4 = inlined_call_operand.vmem [shape: f32[1,128], index: 4, kind: input, shape index: {}]   ;;  %s1720_s5 = inlined_call_operand.hbm [shape: f32[16,128], index: 5, kind: output, shape index: {}]  }
   0x1   :  { %12 = vsyncpa [#allocation3 + $0x1], 0 }
   0x2   :  { %13 = vsyncpa [#allocation6], 0 }
   0x3   :  { %14 = vsyncpa [#allocation4], 0 }
   0x4   :  { %16 = vsyncpa [#allocation4 + $0x1], 0  ;;  %s1461_s18 = smov 0   ;;  %s1463_s19 = smov 0  }
   0x5   :  { %s1465_s20 = smov 0   ;;  %s1467_s21 = smov 0  }
   0x6 LB: > { %s1482_s22 = sadd.s32 4294967295, %s1420_s21   ;;  %s878_s23 = sadd.s32 4294967294, %s1420_s21   ;;  %s1420_s21 = sphi %s1467_s21, %s1740_s21   ;;  %s1416_s20 = sphi %s1465_s20, %s1739_s20   ;;  %s1412_s19 = sphi %s1463_s19, %s1738_s19   ;;  %s1408_s18 = sphi %s1461_s18, %s1737_s18  }
   0x7   : > { %p42_p0 = scmp.ne.s32.totalorder %s1412_s19, %s1408_s18  ;;  %p1721_p1 = scmp.eq.s32.totalorder %s1482_s22, 0 }
   0x8   : > { %p156_p3 = scmp.eq.s32.totalorder %s878_s23, 1  ;;  %p879_p5 = scmp.ge.s32.totalorder %s1420_s21, 1 }
   0x9   : > { %p1491_p4 = por %p1721_p1, %p42_p0  ;;  %p163_p7 = scmp.lt.s32.totalorder %s1420_s21, 3 }
   0xa   : > { %p1496_p6 = por %p156_p3, %p42_p0  ;;  %s1422_s27 = smov [#allocation5]  }
   0xb   : > { %s1724_s24 = scalar_select %p1491_p4, 1, 0 }
   0xc   : > { %s1725_s25 = scalar_select %p1496_p6, 1, 0 }
   0xd   : > { %p1501_p8 = pnand %p879_p5, %p163_p7  ;;  %s175_s28 = sshll.u32 %s1422_s27, 4  ;;  %s1505_s28 = int_to_ptr.vmem [resolvable:$true] %s175_s28 }
   0xe   : > { %s1423_s30 = smov [#allocation7]   ;;  %s1264_s9 = scalar_lea.hbm %s1716_s1, 12544 }
   0xf   : > { %p1200_p9 = pneg %p1501_p8  ;;  %s191_s6 = sshll.u32 %s1423_s30, 4  ;;  %s1516_s6 = int_to_ptr.vmem [resolvable:$true] %s191_s6 }
  0x10   : > { %p1265_p12 = scmp.ne.s32.totalorder %s1716_s1, %s1264_s9  ;;  %p1271_p5 = scmp.lt.u32.totalorder %s1264_s9, %s1716_s1 }
  0x11   : > { %p1512_p11 = pnand %p1200_p9, %p1721_p1 }
  0x13   : > { %p1266_p13 = pneg %p1512_p11 }
  0x15   : > { %p1267_p0 = pnand %p1266_p13, %p1265_p12 }
  0x17   : > { %p1268_p3 = pneg %p1267_p0 }
  0x19   : > { %p1273_p7 = pnand %p1271_p5, %p1268_p3 }
  0x1b   : > { %1276 = shalt.err (!%p1273_p7)
}
  0x1c   : > { %s1277_s14 = scalar_lea.vmem %s1505_s28, 12544  ;;  %p1285_p2 = scmp.lt.s32.totalorder %s1505_s28, %s1505_s28 }
  0x1d   : > { %p1278_p9 = scmp.ne.s32.totalorder %s1505_s28, %s1277_s14  ;;  %p1286_p12 = scmp.lt.s32.totalorder %s1277_s14, %s1277_s14 }
  0x1f   : > { %p1280_p10 = pnand %p1278_p9, %p1266_p13  ;;  %p1287_p0 = por %p1286_p12, %p1285_p2 }
  0x21   : > { %p1281_p1 = pneg %p1280_p10 }
  0x23   : > { %p1288_p6 = pnand %p1287_p0, %p1281_p1 }
  0x25   : > { %1291 = shalt.err (!%p1288_p6)
}
  0x26   : > { %s1424_s15 = smov 128   ;;  %s1425_s16 = smov 8  }
  0x27   : > { %1203 = dma.hbm_to_vmem [thread:$0]  (!%p1512_p11), %s1716_s1, 12544, %s1505_s28, [#allocation6], %s1424_s15, %s1424_s15, %s1425_s16  }
  0x28   : > { %s1292_s7 = scalar_lea.hbm %s1718_s3, 2048 }
  0x29   : > { %p1293_p2 = scmp.ne.s32.totalorder %s1718_s3, %s1292_s7  ;;  %p1299_p10 = scmp.lt.u32.totalorder %s1292_s7, %s1718_s3 }
  0x2b   : > { %p1295_p1 = pnand %p1293_p2, %p1266_p13 }
  0x2d   : > { %p1296_p6 = pneg %p1295_p1 }
  0x2f   : > { %p1301_p3 = pnand %p1299_p10, %p1296_p6 }
  0x31   : > { %1304 = shalt.err (!%p1301_p3)
}
  0x32   : > { %s1305_s28 = scalar_lea.vmem %s1516_s6, 2048  ;;  %p1313_p12 = scmp.lt.s32.totalorder %s1516_s6, %s1516_s6 }
  0x33   : > { %p1306_p5 = scmp.ne.s32.totalorder %s1516_s6, %s1305_s28  ;;  %p1314_p0 = scmp.lt.s32.totalorder %s1305_s28, %s1305_s28 }
  0x35   : > { %p1308_p7 = pnand %p1306_p5, %p1266_p13  ;;  %p1315_p2 = por %p1314_p0, %p1313_p12 }
  0x37   : > { %p1309_p9 = pneg %p1308_p7 }
  0x39   : > { %p1316_p1 = pnand %p1315_p2, %p1309_p9 }
  0x3b   : > { %1319 = shalt.err (!%p1316_p1)
}
  0x3c   : > { %1206 = dma.hbm_to_vmem [thread:$0]  (!%p1512_p11), %s1718_s3, 2048, %s1516_s6, [#allocation6], %s1424_s15, %s1424_s15, %s1425_s16  }
  0x3d   : > { %s1571_s14 = sadd.s32 1, %s1420_s21   ;;  %s29_s29 = sadd.s32 1, %s1416_s20 }
  0x3e   : > { %s26_s17 = ssub.s32 %s1420_s21, %s1571_s14  ;;  %p36_p13 = scmp.ne.s32.totalorder %s1416_s20, %s1412_s19 }
  0x3f   : > { %p27_p6 = scmp.eq.s32.totalorder %s26_s17, 0  ;;  %p37_p10 = scmp.eq.s32.totalorder %s1420_s21, 0 }
  0x40   : > { %p1728_p3 = scmp.eq.s32.totalorder %s1482_s22, 1  ;;  %p1217_p7 = scmp.lt.s32.totalorder %s1420_s21, 2 }
  0x41   : > { %s1587_s27 = scalar_select %p27_p6, %s1416_s20, %s29_s29  }
  0x42   : > { %p1581_p5 = por %p1728_p3, %p36_p13  ;;  %p38_p9 = por %p37_p10, %p36_p13 }
  0x43   : > { %s208_s30 = sand.u32 1, %s1416_s20   ;;  %s1186_s6 = smul.u32 896, %s1420_s21 }
  0x44   : > { %s1729_s23 = scalar_select %p1581_p5, 1, 0 }
  0x45   : > { %s1185_s7 = smul.u32 56, %s208_s30  ;;  %p1591_p11 = pnand %p1217_p7, %p38_p9 }
  0x46   : > { %s1598_s9 = scalar_lea.hbm %s1715_s0, %s1186_s6  ;;  %s209_s28 = scalar_lea.sflag [#allocation3], %s208_s30 }
  0x47   : > { %s212_s10 = scalar_lea.vmem [#allocation2], %s1185_s7  ;;  %s1320_s12 = scalar_lea.hbm %s1598_s9, 896 }
  0x48   : > { %s220_s11 = sshll.u32 %s212_s10, 4  ;;  %p1321_p12 = scmp.ne.s32.totalorder %s1598_s9, %s1320_s12  ;;  %s1600_s11 = int_to_ptr.vmem [resolvable:$true] %s220_s11 }
  0x49   : > { %p1322_p0 = pneg %p1591_p11  ;;  %s1325_s17 = scalar_lea.hbm %s1715_s0, 1792 }
  0x4a   : > { %p1326_p13 = scmp.lt.u32.totalorder %s1598_s9, %s1715_s0  ;;  %p1327_p6 = scmp.lt.u32.totalorder %s1325_s17, %s1320_s12 }
  0x4b   : > { %p1323_p2 = pnand %p1322_p0, %p1321_p12  ;;  %p1329_p3 = scmp.lt.u32.totalorder %s1320_s12, %s1598_s9 }
  0x4c   : > { %p1328_p10 = por %p1327_p6, %p1326_p13 }
  0x4d   : > { %p1324_p1 = pneg %p1323_p2 }
  0x4e   : > { %p1330_p7 = por %p1329_p3, %p1328_p10 }
  0x50   : > { %p1331_p9 = pnand %p1330_p7, %p1324_p1 }
  0x52   : > { %1334 = shalt.err (!%p1331_p9)
}
  0x53   : > { %s1335_s30 = scalar_lea.vmem %s1600_s11, 896  ;;  %s1426_s7 = smov [#allocation2]  }
  0x54   : > { %p1336_p12 = scmp.ne.s32.totalorder %s1600_s11, %s1335_s30  ;;  %s1340_s8 = sshll.u32 %s1426_s7, 4  ;;  %s1341_s8 = int_to_ptr.vmem [resolvable:$false] %s1340_s8 }
  0x55   : > { %s1342_s10 = scalar_lea.vmem %s1341_s8, 1792  ;;  %p1343_p4 = scmp.lt.s32.totalorder %s1600_s11, %s1341_s8 }
  0x56   : > { %p1338_p2 = pnand %p1336_p12, %p1322_p0  ;;  %p1344_p13 = scmp.lt.s32.totalorder %s1342_s10, %s1335_s30 }
  0x58   : > { %p1339_p5 = pneg %p1338_p2  ;;  %p1345_p6 = por %p1344_p13, %p1343_p4 }
  0x5a   : > { %p1346_p10 = pnand %p1345_p6, %p1339_p5 }
  0x5c   : > { %1349 = shalt.err (!%p1346_p10)
}
  0x5d   : > { %1210 = dma.hbm_to_vmem [thread:$0]  (!%p1591_p11), %s1598_s9, 896, %s1600_s11, %s209_s28  }
  0x5e   : > { %229 = sbr.rel (%p1501_p8) target bundleno = 936 (0x3a8), region = 40  ;;  %s1630_s12 = sand.u32 (!%p1501_p8), 1, %s1412_s19  }
  0x5f   : > { %s1187_s13 = smul.u32 (!%p1501_p8), 56, %s1630_s12  ;;  %s232_s29 = scalar_lea.sflag (!%p1501_p8), [#allocation3], %s1630_s12 }
  0x60   : > { %p1731_p4 = scmp.ne.s32.totalorder (!%p1501_p8), %s1724_s24, 0 }
  0x61   : > { %s1634_s17 = scalar_lea.vmem (!%p1501_p8), [#allocation2], %s1187_s13 }
  0x65   : > { %1395 = dma.done.wait (%p1731_p4), %s232_s29, 896  }
  0x66   : > { %1397 = vsyncadd (%p1731_p4), %s232_s29, 4294966400  ;;  %p1732_p5 = scmp.eq.s32.totalorder %s1482_s22, 0 }
  0x68   : > { %1399 = dma.done.wait (%p1732_p5), [#allocation6], 14592   ;;  %p1733_p8 = pmov %p1732_p5 }
  0x69   : > { %v293_v0 = vld [vmem:[#allocation5 + $0x80] sm:$0xff]  ;;  %v294_v1 = vld [vmem:[#allocation5 + $0x88] sm:$0xff]  ;;  %v295_v11 = vld [vmem:[#allocation5 + $0x90] sm:$0xff]  ;;  %vm1428_vm0 = vmmov 0   ;;  %vm382_vm1 = vcmask 130048   ;;  %s887_s11 = sshll.u32 %s1630_s12, 3 }
  0x6a   : > { %1401 = vsyncadd (%p1733_p8), [#allocation6], 4294952704  ;;  %v277_v2 = vld [vmem:[#allocation5] sm:$0xff]  ;;  %v1062_v3 = vpack.c.bf16 %v294_v1, %v293_v0  ;;  %v278_v4 = vld [vmem:[#allocation5 + $0x8] sm:$0xff]  ;;  %s892_s28 = sshll.u32 %s1482_s22, 7  ;;  %s269_s6 = scalar_lea.vmem [#allocation8], %s887_s11 }
  0x6b   : > { %v325_v5 = vld [vmem:[#allocation5 + $0x180] sm:$0xff]  ;;  %v326_v6 = vld [vmem:[#allocation5 + $0x188] sm:$0xff]  ;;  %v1064_v7 = vpack.c.bf16 %v278_v4, %v277_v2  ;;  %v296_v13 = vld [vmem:[#allocation5 + $0x98] sm:$0xff]  ;;  %s789_s16 = sshll.u32 %s269_s6, 4  ;;  %s1671_s8 = scalar_lea.hbm %s1720_s5, %s892_s28  ;;  %s1673_s16 = int_to_ptr.vmem [resolvable:$true] %s789_s16 }
  0x6c   : > { %v1094_v8 = vpack.c.bf16 %v326_v6, %v325_v5  ;;  %v309_v9 = vld [vmem:[#allocation5 + $0x100] sm:$0xff]  ;;  %v310_v10 = vld [vmem:[#allocation5 + $0x108] sm:$0xff]  ;;  %1063 = vmatprep.subr.bf16.mxu0 %v1062_v3  ;;  %v279_v14 = vld [vmem:[#allocation5 + $0x10] sm:$0xff]  ;;  %v1066_v16 = vpack.c.bf16 %v296_v13, %v295_v11  ;;  %s776_s10 = scalar_lea.sflag [#allocation4], %s1630_s12  ;;  %s1350_s13 = scalar_lea.vmem %s1673_s16, 128 }
  0x6d   : > { %v1096_v12 = vpack.c.bf16 %v310_v10, %v309_v9  ;;  %v280_v15 = vld [vmem:[#allocation5 + $0x18] sm:$0xff]  ;;  %1065 = vmatpush3.bf16.msra.mxu0 %v1064_v7  ;;  %v327_v18 = vld [vmem:[#allocation5 + $0x190] sm:$0xff]  ;;  %v297_v23 = vld [vmem:[#allocation5 + $0xa0] sm:$0xff]  ;;  %p1351_p11 = scmp.ne.s32.totalorder %s1673_s16, %s1350_s13  ;;  %p1734_p0 = scmp.ne.s32.totalorder %s1729_s23, 0 }
  0x6e   : > { %1095 = vmatprep.subr.bf16.mxu1 %v1094_v8  ;;  %v1068_v17 = vpack.c.bf16 %v280_v15, %v279_v14  ;;  %v328_v19 = vld [vmem:[#allocation5 + $0x198] sm:$0xff]  ;;  %v311_v20 = vld [vmem:[#allocation5 + $0x110] sm:$0xff]  ;;  %v298_v24 = vld [vmem:[#allocation5 + $0xa8] sm:$0xff]  ;;  %1067 = vmatprep.subr.bf16.mxu0 %v1066_v16  ;;  %s1430_s22 = smov [#allocation8]  }
  0x6f   : > { %1097 = vmatpush3.bf16.msra.mxu1 %v1096_v12  ;;  %v1098_v21 = vpack.c.bf16 %v328_v19, %v327_v18  ;;  %v312_v22 = vld [vmem:[#allocation5 + $0x118] sm:$0xff]  ;;  %v1070_v26 = vpack.c.bf16 %v298_v24, %v297_v23  ;;  %v281_v27 = vld [vmem:[#allocation5 + $0x20] sm:$0xff]  ;;  %v282_v28 = vld [vmem:[#allocation5 + $0x28] sm:$0xff]  ;;  %p1352_p1 = pnand %p1351_p11, %p1734_p0  ;;  %s1354_s29 = sshll.u32 %s1430_s22, 4  ;;  %s1355_s29 = int_to_ptr.vmem [resolvable:$false] %s1354_s29 }
  0x70   : > { %v1100_v25 = vpack.c.bf16 %v312_v22, %v311_v20  ;;  %v329_v29 = vld [vmem:[#allocation5 + $0x1a0] sm:$0xff]  ;;  %v330_v30 = vld [vmem:[#allocation5 + $0x1a8] sm:$0xff]  ;;  %v1072_v33 = vpack.c.bf16 %v282_v28, %v281_v27  ;;  %v299_v35 = vld [vmem:[#allocation5 + $0xb0] sm:$0xff]  ;;  %p1357_p7 = scmp.lt.s32.totalorder %s1673_s16, %s1355_s29 }
  0x71   : > { %1099 = vmatprep.subr.bf16.mxu1 %v1098_v21  ;;  %v313_v31 = vld [vmem:[#allocation5 + $0x120] sm:$0xff]  ;;  %v314_v32 = vld [vmem:[#allocation5 + $0x128] sm:$0xff]  ;;  %1069 = vmatpush3.bf16.msra.mxu0 %v1068_v17  ;;  %v1102_v34 = vpack.c.bf16 %v330_v30, %v329_v29  ;;  %v300_v36 = vld [vmem:[#allocation5 + $0xb8] sm:$0xff]  ;;  %p1353_p3 = pneg %p1352_p1 }
  0x72   : > { %v283_v37 = vld [vmem:[#allocation5 + $0x30] sm:$0xff]  ;;  %1071 = vmatprep.subr.bf16.mxu0 %v1070_v26  ;;  %v1104_v38 = vpack.c.bf16 %v314_v32, %v313_v31  ;;  %v1074_v39 = vpack.c.bf16 %v300_v36, %v299_v35  ;;  %v284_v40 = vld [vmem:[#allocation5 + $0x38] sm:$0xff]  ;;  %v301_v46 = vld [vmem:[#allocation5 + $0xc0] sm:$0xff] }
  0x73   : > { %1101 = vmatpush3.bf16.msra.mxu1 %v1100_v25  ;;  %v331_v41 = vld [vmem:[#allocation5 + $0x1b0] sm:$0xff]  ;;  %v332_v42 = vld [vmem:[#allocation5 + $0x1b8] sm:$0xff]  ;;  %v302_v47 = vld [vmem:[#allocation5 + $0xc8] sm:$0xff]  ;;  %v1076_v48 = vpack.c.bf16 %v284_v40, %v283_v37 }
  0x74   : > { %1103 = vmatprep.subr.bf16.mxu1 %v1102_v34  ;;  %v1106_v43 = vpack.c.bf16 %v332_v42, %v331_v41  ;;  %v315_v44 = vld [vmem:[#allocation5 + $0x130] sm:$0xff]  ;;  %v316_v45 = vld [vmem:[#allocation5 + $0x138] sm:$0xff]  ;;  %v333_v49 = vld [vmem:[#allocation5 + $0x1c0] sm:$0xff]  ;;  %v1078_v52 = vpack.c.bf16 %v302_v47, %v301_v46 }
  0x75   : > { %1073 = vmatpush3.bf16.msra.mxu0 %v1072_v33  ;;  %v334_v50 = vld [vmem:[#allocation5 + $0x1c8] sm:$0xff]  ;;  %v1108_v51 = vpack.c.bf16 %v316_v45, %v315_v44  ;;  %v285_v53 = vld [vmem:[#allocation5 + $0x40] sm:$0xff]  ;;  %v303_v58 = vld [vmem:[#allocation5 + $0xd0] sm:$0xff] }
  0x76   : > { %1075 = vmatprep.subr.bf16.mxu0 %v1074_v39  ;;  %v286_v54 = vld [vmem:[#allocation5 + $0x48] sm:$0xff]  ;;  %v317_v55 = vld [vmem:[#allocation5 + $0x140] sm:$0xff]  ;;  %v1110_v56 = vpack.c.bf16 %v334_v50, %v333_v49  ;;  %v304_v59 = vld [vmem:[#allocation5 + $0xd8] sm:$0xff]  ;;  %v1427_v50 = vmov 0.0|0.0  }
  0x77   : > { %1105 = vmatpush3.bf16.msra.mxu1 %v1104_v38  ;;  %v318_v57 = vld [vmem:[#allocation5 + $0x148] sm:$0xff]  ;;  %v335_v60 = vld [vmem:[#allocation5 + $0x1d0] sm:$0xff]  ;;  %v336_v61 = vld [vmem:[#allocation5 + $0x1d8] sm:$0xff]  ;;  %v1080_v62 = vpack.c.bf16 %v286_v54, %v285_v53  ;;  %v1082_v0 = vpack.c.bf16 %v304_v59, %v303_v58 }
  0x78   : > { %1107 = vmatprep.subr.bf16.mxu1 %v1106_v43  ;;  %v1112_v63 = vpack.c.bf16 %v318_v57, %v317_v55  ;;  %v287_v1 = vld [vmem:[#allocation5 + $0x50] sm:$0xff]  ;;  %v288_v2 = vld [vmem:[#allocation5 + $0x58] sm:$0xff]  ;;  %v1114_v4 = vpack.c.bf16 %v336_v61, %v335_v60  ;;  %v305_v6 = vld [vmem:[#allocation5 + $0xe0] sm:$0xff]  ;;  %v1429_v60 = vmov 0.0  }
  0x79   : > { %1077 = vmatpush3.bf16.msra.mxu0 %v1076_v48  ;;  %v319_v3 = vld [vmem:[#allocation5 + $0x150] sm:$0xff]  ;;  %v320_v5 = vld [vmem:[#allocation5 + $0x158] sm:$0xff]  ;;  %v306_v7 = vld [vmem:[#allocation5 + $0xe8] sm:$0xff]  ;;  %v1084_v10 = vpack.c.bf16 %v288_v2, %v287_v1 }
  0x7a   : > { %1079 = vmatprep.subr.bf16.mxu0 %v1078_v52  ;;  %v337_v8 = vld [vmem:[#allocation5 + $0x1e0] sm:$0xff]  ;;  %v338_v9 = vld [vmem:[#allocation5 + $0x1e8] sm:$0xff]  ;;  %v271_v12 = vld [vmem:[%s1634_s17 + $0x8] sm:$0xff]  ;;  %v1116_v13 = vpack.c.bf16 %v320_v5, %v319_v3  ;;  %v1086_v14 = vpack.c.bf16 %v306_v7, %v305_v6 }
  0x7b   : > { %1109 = vmatpush3.bf16.msra.mxu1 %v1108_v51  ;;  %v289_v11 = vld [vmem:[#allocation5 + $0x60] sm:$0xff]  ;;  %v290_v15 = vld [vmem:[#allocation5 + $0x68] sm:$0xff]  ;;  %v1118_v18 = vpack.c.bf16 %v338_v9, %v337_v8  ;;  %v307_v19 = vld [vmem:[#allocation5 + $0xf0] sm:$0xff]  ;;  %450 = vmatprep.mubr.f32.mxu0 %v271_v12 }
  0x7c   : > { %1111 = vmatprep.subr.bf16.mxu1 %v1110_v56  ;;  %v321_v16 = vld [vmem:[#allocation5 + $0x160] sm:$0xff]  ;;  %v322_v17 = vld [vmem:[#allocation5 + $0x168] sm:$0xff]  ;;  %v308_v20 = vld [vmem:[#allocation5 + $0xf8] sm:$0xff]  ;;  %v1088_v24 = vpack.c.bf16 %v290_v15, %v289_v11 }
  0x7d   : > { %1081 = vmatpush3.bf16.msra.mxu0 %v1080_v62  ;;  %v273_v21 = vld [vmem:[%s1634_s17 + $0x18] sm:$0xff]  ;;  %v339_v22 = vld [vmem:[#allocation5 + $0x1f0] sm:$0xff]  ;;  %v340_v23 = vld [vmem:[#allocation5 + $0x1f8] sm:$0xff]  ;;  %v1120_v25 = vpack.c.bf16 %v322_v17, %v321_v16  ;;  %v1090_v26 = vpack.c.bf16 %v308_v20, %v307_v19 }
  0x7e   : > { %1083 = vmatprep.subr.bf16.mxu0 %v1082_v0  ;;  %520 = vmatprep.mubr.f32.mxu1 %v273_v21  ;;  %v291_v27 = vld [vmem:[#allocation5 + $0x70] sm:$0xff]  ;;  %v292_v28 = vld [vmem:[#allocation5 + $0x78] sm:$0xff]  ;;  %v1122_v30 = vpack.c.bf16 %v340_v23, %v339_v22  ;;  %v357_v32 = vld [vmem:[#allocation5 + $0x280] sm:$0xff] }
  0x7f   : > { %1113 = vmatpush3.bf16.msra.mxu1 %v1112_v63  ;;  %v323_v29 = vld [vmem:[#allocation5 + $0x170] sm:$0xff]  ;;  %v324_v31 = vld [vmem:[#allocation5 + $0x178] sm:$0xff]  ;;  %v358_v33 = vld [vmem:[#allocation5 + $0x288] sm:$0xff]  ;;  %v1092_v34 = vpack.c.bf16 %v292_v28, %v291_v27 }
  0x80   : > { %1115 = vmatprep.subr.bf16.mxu1 %v1114_v4  ;;  %v1124_v35 = vpack.c.bf16 %v324_v31, %v323_v29  ;;  %v1126_v36 = vpack.c.bf16 %v358_v33, %v357_v32  ;;  %v341_v37 = vld [vmem:[#allocation5 + $0x200] sm:$0xff]  ;;  %v342_v38 = vld [vmem:[#allocation5 + $0x208] sm:$0xff]  ;;  %v359_v39 = vld [vmem:[#allocation5 + $0x290] sm:$0xff] }
  0x81   : > { %1085 = vmatpush3.bf16.msra.mxu0 %v1084_v10  ;;  %v360_v40 = vld [vmem:[#allocation5 + $0x298] sm:$0xff]  ;;  %v270_v41 = vld [vmem:[%s1634_s17] sm:$0xff]  ;;  %v1128_v42 = vpack.c.bf16 %v342_v38, %v341_v37  ;;  %v361_v47 = vld [vmem:[#allocation5 + $0x2a0] sm:$0xff] }
  0x82   : > { %1087 = vmatprep.subr.bf16.mxu0 %v1086_v14  ;;  %v272_v43 = vld [vmem:[%s1634_s17 + $0x10] sm:$0xff]  ;;  %v343_v44 = vld [vmem:[#allocation5 + $0x210] sm:$0xff]  ;;  %v1130_v45 = vpack.c.bf16 %v360_v40, %v359_v39  ;;  %v362_v48 = vld [vmem:[#allocation5 + $0x2a8] sm:$0xff] }
  0x83   : > { %1117 = vmatpush3.bf16.msra.mxu1 %v1116_v13  ;;  %v344_v46 = vld [vmem:[#allocation5 + $0x218] sm:$0xff]  ;;  %v373_v51 = vld [vmem:[#allocation5 + $0x300] sm:$0xff]  ;;  %v374_v52 = vld [vmem:[#allocation5 + $0x308] sm:$0xff]  ;;  %v1134_v55 = vpack.c.bf16 %v362_v48, %v361_v47 }
  0x84   : > { %1119 = vmatprep.subr.bf16.mxu1 %v1118_v18  ;;  %v275_v49 = vld [vmem:[%s1634_s17 + $0x28] sm:$0xff]  ;;  %v1159_v53 = vpack.c.bf16 %v374_v52, %v373_v51  ;;  %v1132_v54 = vpack.c.bf16 %v344_v46, %v343_v44  ;;  %v345_v56 = vld [vmem:[#allocation5 + $0x220] sm:$0xff]  ;;  %v346_v57 = vld [vmem:[#allocation5 + $0x228] sm:$0xff] }
  0x85   : > { %1089 = vmatpush3.bf16.msra.mxu0 %v1088_v24  ;;  %v363_v58 = vld [vmem:[#allocation5 + $0x2b0] sm:$0xff]  ;;  %v364_v59 = vld [vmem:[#allocation5 + $0x2b8] sm:$0xff]  ;;  %v1136_v62 = vpack.c.bf16 %v346_v57, %v345_v56  ;;  %v365_v2 = vld [vmem:[#allocation5 + $0x2c0] sm:$0xff] }
  0x86   : > { %1091 = vmatprep.subr.bf16.mxu0 %v1090_v26  ;;  %v276_v61 = vld [vmem:[%s1634_s17 + $0x30] sm:$0xff]  ;;  %v1138_v63 = vpack.c.bf16 %v364_v59, %v363_v58  ;;  %v347_v0 = vld [vmem:[#allocation5 + $0x230] sm:$0xff]  ;;  %v366_v3 = vld [vmem:[#allocation5 + $0x2c8] sm:$0xff] }
  0x87   : > { %1121 = vmatpush3.bf16.msra.mxu1 %v1120_v25  ;;  %v348_v1 = vld [vmem:[#allocation5 + $0x238] sm:$0xff]  ;;  %v1142_v5 = vpack.c.bf16 %v366_v3, %v365_v2  ;;  %v349_v6 = vld [vmem:[#allocation5 + $0x240] sm:$0xff]  ;;  %v350_v7 = vld [vmem:[#allocation5 + $0x248] sm:$0xff] }
  0x88   : > { %1123 = vmatprep.subr.bf16.mxu1 %v1122_v30  ;;  %v1140_v4 = vpack.c.bf16 %v348_v1, %v347_v0  ;;  %v367_v8 = vld [vmem:[#allocation5 + $0x2d0] sm:$0xff]  ;;  %v368_v9 = vld [vmem:[#allocation5 + $0x2d8] sm:$0xff]  ;;  %v1144_v10 = vpack.c.bf16 %v350_v7, %v349_v6  ;;  %v369_v14 = vld [vmem:[#allocation5 + $0x2e0] sm:$0xff] }
  0x89   : > { %1093 = vmatpush3.bf16.msra.mxu0 %v1092_v34  ;;  %v1146_v11 = vpack.c.bf16 %v368_v9, %v367_v8  ;;  %v351_v12 = vld [vmem:[#allocation5 + $0x250] sm:$0xff]  ;;  %v352_v13 = vld [vmem:[#allocation5 + $0x258] sm:$0xff]  ;;  %v370_v15 = vld [vmem:[#allocation5 + $0x2e8] sm:$0xff] }
  0x8a   : > { %1127 = vmatprep.subr.bf16.mxu0 %v1126_v36  ;;  %v1148_v16 = vpack.c.bf16 %v352_v13, %v351_v12  ;;  %v1150_v17 = vpack.c.bf16 %v370_v15, %v369_v14  ;;  %v353_v18 = vld [vmem:[#allocation5 + $0x260] sm:$0xff]  ;;  %v354_v19 = vld [vmem:[#allocation5 + $0x268] sm:$0xff]  ;;  %v371_v20 = vld [vmem:[#allocation5 + $0x2f0] sm:$0xff] }
  0x8b   : > { %1125 = vmatpush3.bf16.msra.mxu1 %v1124_v35  ;;  %v372_v21 = vld [vmem:[#allocation5 + $0x2f8] sm:$0xff]  ;;  %v1152_v22 = vpack.c.bf16 %v354_v19, %v353_v18  ;;  %v355_v24 = vld [vmem:[#allocation5 + $0x270] sm:$0xff]  ;;  %v669_v30 = vld [vmem:[#allocation7 + $0x10] sm:$0xff] }
  0x8c   : > { %1158 = vmatprep.subr.bf16.mxu1 %v1427_v50  ;;  %451 = vmatmul.mubr.f32.vlgmr.msra.gmra.mrb[0].mxu0 %v270_v41  ;;  %v1154_v23 = vpack.c.bf16 %v372_v21, %v371_v20  ;;  %v356_v25 = vld [vmem:[#allocation5 + $0x278] sm:$0xff]  ;;  %v274_v27 = vld [vmem:[%s1634_s17 + $0x20] sm:$0xff]  ;;  %v673_v37 = vld [vmem:[#allocation7 + $0x30] sm:$0xff]  ;;  %s1356_s17 = scalar_lea.vmem %s1355_s29, 256 }
  0x8d   : > { %1129 = vmatpush3.bf16.msra.mxu0 %v1128_v42  ;;  %590 = vmatprep.mubr.f32.mxu0 %v275_v49  ;;  %v1156_v26 = vpack.c.bf16 %v356_v25, %v355_v24  ;;  %v667_v28 = vld [vmem:[#allocation7] sm:$0xff]  ;;  %v668_v29 = vld [vmem:[#allocation7 + $0x8] sm:$0xff]  ;;  %v670_v32 = vld [vmem:[#allocation7 + $0x18] sm:$0xff]  ;;  %p1358_p9 = scmp.lt.s32.totalorder %s1356_s17, %s1350_s13 }
  0x8e   : > { %521 = vmatmul.mubr.f32.vlgmr.msra.gmra.mrb[0].mxu1 %v272_v43  ;;  %1131 = vmatprep.subr.bf16.mxu0 %v1130_v45  ;;  %v1162_v31 = vpack.c.bf16 %v668_v29, %v667_v28  ;;  %v1165_v33 = vpack.c.bf16 %v670_v32, %v669_v30  ;;  %v671_v34 = vld [vmem:[#allocation7 + $0x20] sm:$0xff]  ;;  %v672_v35 = vld [vmem:[#allocation7 + $0x28] sm:$0xff]  ;;  %v674_v38 = vld [vmem:[#allocation7 + $0x38] sm:$0xff] }
  0x8f   : > { %1160 = vmatpush3.bf16.msra.mxu1 %v1159_v53  ;;  %1024 = vmatprep.mubr.msk.f32.mxu1 %vm1428_vm0, %v1429_v60  ;;  %v1168_v36 = vpack.c.bf16 %v672_v35, %v671_v34  ;;  %v1171_v39 = vpack.c.bf16 %v674_v38, %v673_v37  ;;  %v675_v40 = vld [vmem:[#allocation7 + $0x40] sm:$0xff]  ;;  %v676_v41 = vld [vmem:[#allocation7 + $0x48] sm:$0xff]  ;;  %v677_v43 = vld [vmem:[#allocation7 + $0x50] sm:$0xff]  ;;  %p1359_p12 = por %p1358_p9, %p1357_p7 }
  0x90   : > { %1161 = vmatprep.subr.bf16.mxu1 %v1427_v50  ;;  %v1174_v42 = vpack.c.bf16 %v676_v41, %v675_v40  ;;  %v678_v44 = vld [vmem:[#allocation7 + $0x58] sm:$0xff]  ;;  %v679_v46 = vld [vmem:[#allocation7 + $0x60] sm:$0xff]  ;;  %v680_v47 = vld [vmem:[#allocation7 + $0x68] sm:$0xff] }
  0x91   : > { %1133 = vmatpush3.bf16.msra.mxu0 %v1132_v54  ;;  %v1177_v45 = vpack.c.bf16 %v678_v44, %v677_v43  ;;  %v1180_v48 = vpack.c.bf16 %v680_v47, %v679_v46  ;;  %v681_v49 = vld [vmem:[#allocation7 + $0x70] sm:$0xff]  ;;  %v682_v51 = vld [vmem:[#allocation7 + $0x78] sm:$0xff]  ;;  %v888_v54 = vld [vmem:[%s1717_s2] ss:$0 sm:$0xff]  ;;  %p1360_p2 = pnand %p1359_p12, %p1353_p3 }
  0x92   : > { %1135 = vmatprep.subr.bf16.mxu0 %v1134_v55  ;;  %1025 = vmatmul.mubr.msk.f32.vlgmr.msra.gmra.mrb[2].mxu1 %vm382_vm1, %v276_v61  ;;  %v1183_v52 = vpack.c.bf16 %v682_v51, %v681_v49  ;;  %v890_v6 = vld [vmem:[%s1719_s4] ss:$0 sm:$0xff] }
  0x93   : > { %1059 = vmatprep.mubr.msk.f32.mxu1 %vm1428_vm0, %v1429_v60  ;;  %1163 = vmatpush3.bf16.msra.mxu1 %v1162_v31 }
  0x94   : > { %1164 = vmatprep.subr.bf16.mxu1 %v1427_v50 }
  0x95   : > { %1137 = vmatpush3.bf16.msra.mxu0 %v1136_v62 }
  0x96   : > { %1139 = vmatprep.subr.bf16.mxu0 %v1138_v63 }
  0x97   : > { %1166 = vmatpush3.bf16.msra.mxu1 %v1165_v33 }
  0x98   : > { %1167 = vmatprep.subr.bf16.mxu1 %v1427_v50 }
  0x99   : > { %1141 = vmatpush3.bf16.msra.mxu0 %v1140_v4 }
  0x9a   : > { %1143 = vmatprep.subr.bf16.mxu0 %v1142_v5  ;;  %v761_v5 = vlaneseq }
  0x9b   : > { %1169 = vmatpush3.bf16.msra.mxu1 %v1168_v36 }
  0x9c   : > { %1170 = vmatprep.subr.bf16.mxu1 %v1427_v50  ;;  %v762_v7 = vand.u32 127, %v761_v5 }
  0x9d   : > { %1145 = vmatpush3.bf16.msra.mxu0 %v1144_v10 }
  0x9e   : > { %1147 = vmatprep.subr.bf16.mxu0 %v1146_v11  ;;  %vm763_vm2 = vcmp.lt.s32.totalorder %v762_v7, 10 }
  0x9f   : > { %1172 = vmatpush3.bf16.msra.mxu1 %v1171_v39 }
  0xa0   : > { %1173 = vmatprep.subr.bf16.mxu1 %v1427_v50 }
  0xa1   : > { %1149 = vmatpush3.bf16.msra.mxu0 %v1148_v16 }
  0xa2   : > { %1151 = vmatprep.subr.bf16.mxu0 %v1150_v17 }
  0xa3   : > { %1175 = vmatpush3.bf16.msra.mxu1 %v1174_v42 }
  0xa4   : > { %1176 = vmatprep.subr.bf16.mxu1 %v1427_v50 }
  0xa5   : > { %1153 = vmatpush3.bf16.msra.mxu0 %v1152_v22 }
  0xa6   : > { %1155 = vmatprep.subr.bf16.mxu0 %v1154_v23 }
  0xa7   : > { %1178 = vmatpush3.bf16.msra.mxu1 %v1177_v45 }
  0xa8   : > { %1179 = vmatprep.subr.bf16.mxu1 %v1427_v50 }
  0xa9   : > { %1157 = vmatpush3.bf16.msra.mxu0 %v1156_v26 }
  0xab   : > { %1181 = vmatpush3.bf16.msra.mxu1 %v1180_v48 }
  0xac   : > { %591 = vmatmul.mubr.f32.vlgmr.msra.gmra.mrb[2].mxu0 %v274_v27  ;;  %1182 = vmatprep.subr.bf16.mxu1 %v1427_v50 }
  0xaf   : > { %1184 = vmatpush3.bf16.msra.mxu1 %v1183_v52 }
 0x15f   : > { %v927_v53 = vpop.f32.mrb[0].mxu0 }
 0x160   : > { %v928_v55 = vpop.f32.mrb[1].mxu0 }
 0x161   : > { %v962_v56 = vpop.f32.mrb[0].mxu1  ;;  %v929_v57 = vadd.f32 %v928_v55, %v927_v53 }
 0x162   : > { %v963_v58 = vpop.f32.mrb[1].mxu1 }
 0x163   : > { %v964_v59 = vadd.f32 %v963_v58, %v962_v56  ;;  %v453_v60 = vadd.f32 %v929_v57, %v888_v54 }
 0x165   : > { %v523_v61 = vadd.f32 %v964_v59, %v453_v60  ;;  %v662_v62 = vpop.f32.mrb[2].mxu1 }
 0x166   : > { %v1026_v63 = vpop.f32.mrb[3].mxu1 }
 0x17f   : > { %v997_v0 = vpop.f32.mrb[2].mxu0 }
 0x180   : > { %v998_v50 = vpop.f32.mrb[3].mxu0 }
 0x181   : > { %v999_v1 = vadd.f32 %v998_v50, %v997_v0 }
 0x183   : > { %v593_v2 = vadd.f32 %v999_v1, %v523_v61 }
 0x185   : > { %v663_v3 = vadd.f32 %v662_v62, %v593_v2 }
 0x187   : > { %v666_v4 = vmax.f32 %v663_v3, 0.0 }
 0x189   : > { %1060 = vmatmul.mubr.f32.vlgmr.msra.gmra.mrb[4].mxu1 %v666_v4 }
 0x25c   : > { %v756_v8 = vpop.f32.mrb[4].mxu1 }
 0x25d   : > { %v757_v9 = vadd.f32 %v890_v6, %v756_v8  ;;  %v1061_v10 = vpop.f32.mrb[5].mxu1 }
 0x25f   : > { %v760_v11 = vmax.f32 %v757_v9, 0.0 }
 0x261   : > { %v764_v12 = vsel %vm763_vm2, %v760_v11, -inf }
 0x262   : > { %765 = vmax.xlane.f32.xlu0 %v764_v12 }
 0x2ef   : > { %v766_v13 = vpop.xlane.xlu0 %765 }
 0x2f0   : > { %v767_v14 = vsub.f32 %v764_v12, %v766_v13 }
 0x2f2   : > { %v768_v15 = vmul.f32 1.442695, %v767_v14 }
 0x2f4   : > { %1260 = vpow2.f32 %v768_v15 }
 0x2fe   : > { %v1261_v16 = vpop.eup %1260 }
 0x2ff   : > { %770 = vadd.xlane.f32.xlu0 %v1261_v16 }
 0x38c   : > { %v771_v17 = vpop.xlane.xlu0 %770 }
 0x38d   : > { %1262 = vrcp.f32 %v771_v17 }
 0x397   : > { %v1263_v18 = vpop.eup %1262 }
 0x398   : > { %v773_v19 = vmul.f32 %v1263_v18, %v1261_v16 }
 0x39a   : > { %774 = vst [vmem:[%s269_s6] sm:$0xff] %v773_v19 }
 0x39b   : > { %1363 = shalt.err (!%p1360_p2)
}
 0x39c   : > { %s1364_s12 = scalar_lea.hbm %s1671_s8, 128  ;;  %s1368_s15 = scalar_lea.hbm %s1720_s5, 256 }
 0x39d   : > { %p1365_p13 = scmp.ne.s32.totalorder %s1671_s8, %s1364_s12  ;;  %p1369_p4 = scmp.lt.u32.totalorder %s1671_s8, %s1720_s5 }
 0x39e   : > { %p1370_p5 = scmp.lt.u32.totalorder %s1368_s15, %s1364_s12  ;;  %p1372_p11 = scmp.lt.u32.totalorder %s1364_s12, %s1671_s8 }
 0x39f   : > { %p1366_p6 = pnand %p1365_p13, %p1734_p0 }
 0x3a0   : > { %p1371_p8 = por %p1370_p5, %p1369_p4 }
 0x3a1   : > { %p1367_p10 = pneg %p1366_p6 }
 0x3a2   : > { %p1373_p1 = por %p1372_p11, %p1371_p8 }
 0x3a4   : > { %p1374_p3 = pnand %p1373_p1, %p1367_p10 }
 0x3a6   : > { %1377 = shalt.err (!%p1374_p3)
}
 0x3a7   : > { %1198 = dma.vmem_to_hbm [thread:$0]  (%p1734_p0), %s1673_s16, 128, %s1671_s8, %s776_s10  }
 0x3a8 PF: > { %s801_s28 = sand.u32 1, %s1408_s18   ;;  %p1735_p7 = scmp.ne.s32.totalorder %s1725_s25, 0 }
 0x3a9   : > { %p1736_p9 = scmp.ge.s32.totalorder %s1420_s21, 2  ;;  %s802_s6 = scalar_lea.sflag [#allocation4], %s801_s28 }
 0x3ab   : > { %p1212_p12 = pnand %p1736_p9, %p1735_p7 }
 0x3ad   : > { %1403 = dma.done.wait (!%p1212_p12), %s802_s6, 128  }
 0x3ae   : > { %1405 = vsyncadd (!%p1212_p12), %s802_s6, 4294967168  ;;  %p19_p2 = scmp.ge.s32.totalorder %s1571_s14, 4   ;;  %s1737_s18 = smov %s1412_s19 }
 0x3af   : > { %s1738_s19 = smov %s1416_s20  ;;  %s1739_s20 = smov %s1587_s27 }
 0x3b0   : > { %s1740_s21 = smov %s1571_s14  ;;  %21 = sbr.rel (!%p19_p2) target bundleno = 6 (0x6), region = 93 }
 0x3b7   :  { %807 = vsyncpa [#allocation3], 1 }
 0x3b8   :  { %809 = vsyncpa [#allocation3 + $0x1], 1 }
 0x3b9   :  { %810 = vsyncpa [#allocation6], 1 }
 0x3ba   :  { %811 = vsyncpa [#allocation4], 1 }
 0x3bb   :  { %813 = vsyncpa [#allocation4 + $0x1], 1 }

</bundles_post_ra>
